<compile_context>
chip_gen: v5e
topology: v5e:2x2
jax: 0.10.0
libtpu: 0.0.40
codegen_flags: <defaults>
</compile_context>

<pallas_src>
import functools

import jax
import jax.numpy as jnp
from jax import lax
from jax.experimental import pallas as pl
from jax.experimental.pallas import tpu as pltpu


def _logreg_kernel(x_ref, w_ref, o_ref, *, use_mxu):
    x = x_ref[...]                       # (TB, F) f32
    w = w_ref[...]                       # (O,  F) f32  (nn.Linear layout)
    if use_mxu:
        # General classifier head: contract on F directly (no transposed weight copy).
        z = lax.dot_general(
            x, w,
            dimension_numbers=(((1,), (1,)), ((), ())),
            preferred_element_type=jnp.float32,
        )                                # (TB, O)
    else:
        # O == 1: VPU elementwise multiply + XLU lane reduce; MXU would be <1% utilized.
        z = jnp.sum(x * w, axis=-1, keepdims=True)   # (1,F) broadcasts over (TB,F)
    # EUP-friendly sigmoid: exp issues on the otherwise-idle EUP slot; reciprocal kept
    # exact (approx=False) so results match the reference bit-for-bit within f32 noise.
    e = jnp.exp(-z)
    o_ref[...] = pl.reciprocal(1.0 + e, approx=False).astype(o_ref.dtype)


def _pick_batch_tile(B, F, O, tile_budget_bytes=32 * 1024 * 1024):
    """Largest batch tile (multiple of 8, <= 1024) such that the double-buffered x and
    output tiles plus the resident weight fit the scoped-VMEM budget on v5e/v6e/v7x."""
    bytes_per_row = 4 * (2 * F + 2 * O)     # 2x-buffered x row + 2x-buffered out row (f32)
    fixed = 4 * O * F                       # resident weight block
    tb = (tile_budget_bytes - fixed) // max(bytes_per_row, 1)
    tb = max(8, min(int(tb), 1024))
    tb = (tb // 8) * 8                      # sublane alignment for the (8,128) rule
    if B <= tb:
        return B                            # single full-extent block (always legal)
    return tb


def logreg_forward(x, weight):
    """Pallas equivalent of LogReg.forward: sigmoid(x @ weight.T), no bias.

    x:      (B, n_feature) float32
    weight: (n_output, n_feature) float32  -- nn.Linear weight layout (not transposed)
    returns (B, n_output) float32
    """
    # NOTE: if accuracy allows, x/weight could be fed as bfloat16 (accumulate in f32)
    # to halve HBM traffic; kept f32 here to match torch.FloatTensor semantics.
    x = x.astype(jnp.float32)
    w = weight.astype(jnp.float32)
    B, F = x.shape
    O, Fw = w.shape
    assert Fw == F, (Fw, F)

    TB = _pick_batch_tile(B, F, O)
    grid = (pl.cdiv(B, TB),)
    use_mxu = O > 1

    kernel = functools.partial(_logreg_kernel, use_mxu=use_mxu)

    return pl.pallas_call(
        kernel,
        out_shape=jax.ShapeDtypeStruct((B, O), jnp.float32),
        grid_spec=pltpu.PrefetchScalarGridSpec(
            num_scalar_prefetch=0,
            grid=grid,
            in_specs=[
                pl.BlockSpec((TB, F), lambda i: (i, 0)),   # streamed, double-buffered
                pl.BlockSpec((O, F), lambda i: (0, 0)),    # weight resident across tiles
            ],
            out_specs=pl.BlockSpec((TB, O), lambda i: (i, 0)),
        ),
        compiler_params=pltpu.CompilerParams(
            # Independent batch tiles -> shard across both TensorCores on v7x
            # (neutral on single-TC v5e/v6e).
            dimension_semantics=("parallel",),
            # Explicit scoped-VMEM limit: valid on 128-MiB v5e/v6e and 64-MiB v7x.
            vmem_limit_bytes=48 * 1024 * 1024,
        ),
    )(x, w)


if __name__ == "__main__":
    key = jax.random.PRNGKey(0)
    k_x, k_w = jax.random.split(key)

    batch = 8
    n_feature = 32
    n_output = 1

    x = jax.random.normal(k_x, (batch, n_feature), dtype=jnp.float32)
    # Deterministic "init" mimicking nn.Linear's uniform(-1/sqrt(F), 1/sqrt(F))
    bound = 1.0 / (n_feature ** 0.5)
    weight = jax.random.uniform(
        k_w, (n_output, n_feature), minval=-bound, maxval=bound, dtype=jnp.float32
    )

    out = logreg_forward(x, weight)
    jax.block_until_ready(out)

    ref = jax.nn.sigmoid(x @ weight.T)
    assert out.shape == (batch, n_output)
    assert jnp.allclose(out, ref, atol=1e-5, rtol=1e-5)

    # Exercise the multi-tile (pipelined, "parallel") batch path.
    xb = jax.random.normal(jax.random.PRNGKey(1), (2048, n_feature), dtype=jnp.float32)
    out_b = logreg_forward(xb, weight)
    jax.block_until_ready(out_b)
    assert jnp.allclose(out_b, jax.nn.sigmoid(xb @ weight.T), atol=1e-5, rtol=1e-5)

    # Exercise the MXU (dot_general) path for a wider classifier head.
    w4 = jax.random.uniform(
        jax.random.PRNGKey(2), (4, n_feature), minval=-bound, maxval=bound,
        dtype=jnp.float32,
    )
    out4 = logreg_forward(xb, w4)
    jax.block_until_ready(out4)
    assert jnp.allclose(out4, jax.nn.sigmoid(xb @ w4.T), atol=1e-5, rtol=1e-5)

    print("KERNEL_OK")
</pallas_src>

<mosaic_0001>
module attributes {stable_mosaic.version = 11 : i64} {
  func.func @_logreg_kernel(%arg0: i32, %arg1: memref<8x32xf32, #tpu.memory_space<vmem>>, %arg2: memref<1x32xf32, #tpu.memory_space<vmem>>, %arg3: memref<8x1xf32, #tpu.memory_space<vmem>>) attributes {dimension_semantics = [#tpu.dimension_semantics<parallel>], iteration_bounds = array<i64: 1>, scalar_prefetch = 0 : i64, scratch_operands = 0 : i64, tpu.core_type = #tpu.core_type<tc>, window_params = [{transform_indices = @transform_0, window_bounds = array<i64: 8, 32>}, {pipeline_mode = #tpu.pipeline_mode<synchronous>, transform_indices = @transform_1, window_bounds = array<i64: 1, 32>}, {transform_indices = @transform_2, window_bounds = array<i64: 8, 1>}]} {
    %c0 = arith.constant 0 : index
    %c0_0 = arith.constant 0 : index
    %0 = vector.load %arg1[%c0, %c0_0] : memref<8x32xf32, #tpu.memory_space<vmem>>, vector<8x32xf32>
    %c0_1 = arith.constant 0 : index
    %c0_2 = arith.constant 0 : index
    %1 = vector.load %arg2[%c0_1, %c0_2] : memref<1x32xf32, #tpu.memory_space<vmem>>, vector<1x32xf32>
    %2 = vector.broadcast %1 : vector<1x32xf32> to vector<8x32xf32>
    %3 = arith.mulf %0, %2 : vector<8x32xf32>
    %cst = arith.constant dense<0.000000e+00> : vector<8xf32>
    %4 = vector.multi_reduction <add>, %3, %cst [1] : vector<8x32xf32> to vector<8xf32>
    %5 = vector.shape_cast %4 : vector<8xf32> to vector<8x1xf32>
    %cst_3 = arith.constant 0.000000e+00 : f32
    %6 = vector.broadcast %cst_3 : f32 to vector<8x1xf32>
    %7 = arith.subf %6, %5 : vector<8x1xf32>
    %8 = math.exp %7 : vector<8x1xf32>
    %cst_4 = arith.constant 1.000000e+00 : f32
    %9 = vector.broadcast %cst_4 : f32 to vector<8x1xf32>
    %10 = arith.addf %9, %8 : vector<8x1xf32>
    %11 = tpu.reciprocal %10 : vector<8x1xf32> -> vector<8x1xf32>
    %c0_5 = arith.constant 0 : index
    %c0_6 = arith.constant 0 : index
    %12 = vector.load %arg3[%c0_5, %c0_6] : memref<8x1xf32, #tpu.memory_space<vmem>>, vector<8x1xf32>
    tpu.vector_store %arg3[%c0_5, %c0_6], %11 {strides = array<i32>} : memref<8x1xf32, #tpu.memory_space<vmem>>, vector<8x1xf32>,
    return
  }
  func.func @transform_0(%arg0: i32) -> (i32, i32) {
    %c0_i32 = arith.constant 0 : i32
    %c0_i32_0 = arith.constant 0 : i32
    return %arg0, %c0_i32 : i32, i32
  }
  func.func @transform_1(%arg0: i32) -> (i32, i32) {
    %c0_i32 = arith.constant 0 : i32
    %c0_i32_0 = arith.constant 0 : i32
    %c0_i32_1 = arith.constant 0 : i32
    return %c0_i32, %c0_i32_0 : i32, i32
  }
  func.func @transform_2(%arg0: i32) -> (i32, i32) {
    %c0_i32 = arith.constant 0 : i32
    %c0_i32_0 = arith.constant 0 : i32
    return %arg0, %c0_i32 : i32, i32
  }
}

</mosaic_0001>

<bundles_post_ra>
// kernel: tpu_custom_call.1
= control target key start
LH: loop header
LB: loop body
LE: loop exit
PB: predicated region body
PF: predicated region fallthrough
CT: control target
= control target key end

     0   :  { %7 = vsyncpa [#allocation3], 0  ;;  %s160_s0 = inlined_call_operand.hbm [shape: f32[8,32], index: 0, kind: input, shape index: {}]   ;;  %s161_s1 = inlined_call_operand.hbm [shape: f32[1,32], index: 1, kind: input, shape index: {}]   ;;  %s162_s2 = inlined_call_operand.vmem [shape: f32[8,1], index: 2, kind: output, shape index: {}]  }
   0x1   :  { %s14_s11 = sshll.u32 %s160_s0, 4  ;;  %s15_s11 = int_to_ptr.hbm [resolvable:$true] %s14_s11 }
   0x2   :  { %8 = vsyncpa [#allocation5], 0  ;;  %s134_s12 = smov [#allocation2]   ;;  %s25_s16 = sshll.u32 %s161_s1, 4  ;;  %s26_s16 = int_to_ptr.hbm [resolvable:$true] %s25_s16 }
   0x3   :  { %s16_s13 = sshll.u32 %s134_s12, 4  ;;  %s135_s17 = smov [#allocation4]   ;;  %s17_s13 = int_to_ptr.vmem [resolvable:$true] %s16_s13 }
   0x4   :  { %19 = dma.hbm_to_vmem [thread:$0]  %s15_s11, 128, %s17_s13, [#allocation3]  }
   0x5   :  { %s27_s18 = sshll.u32 %s135_s17, 4  ;;  %s28_s18 = int_to_ptr.vmem [resolvable:$true] %s27_s18 }
   0x6   :  { %30 = dma.hbm_to_vmem [thread:$0]  %s26_s16, 16, %s28_s18, [#allocation5]  }
   0x7   :  { %130 = dma.done.wait [#allocation3], 128  }
   0x8   :  { %131 = vsyncadd [#allocation3], 4294967168 }
   0x9   :  { %132 = dma.done.wait [#allocation5], 16  }
   0xa   :  { %133 = vsyncadd [#allocation5], 4294967280  ;;  %v39_v0 = vld [vmem:[#allocation2] sm:$0xff]  ;;  %v77_v1 = vld [vmem:[#allocation4] ss:$0 sm:$0xff]  ;;  %vm45_vm0 = vcmask 261120  }
   0xb   :  { %v44_v2 = vmul.f32 %v77_v1, %v39_v0  ;;  %vm67_vm4 = vcmask 7168  }
   0xd   :  { %v46_v3 = vsel %vm45_vm0, %v44_v2, 0.0 }
   0xe   :  { %47 = vadd.xlane.f32.xlu0 %v46_v3 }
  0x81   :  { %v48_v4 = vpop.xlane.xlu0 %47 }
  0x82   :  { %v49_v5 = vsub.f32 0.0, %v48_v4 }
  0x84   :  { %v50_v6 = vmul.f32 1.442695, %v49_v5 }
  0x86   :  { %78 = vpow2.f32 %v50_v6 }
  0x8c   :  { %v79_v7 = vpop.eup %78 }
  0x8d   :  { %v52_v8 = vadd.f32 1.0, %v79_v7 }
  0x8f   :  { %80 = vrcp.f32 %v52_v8  ;;  %v64_v12 = vand.u32 2147483648, %v52_v8  ;;  %v62_v14 = vand.u32 2147483647, %v52_v8  ;;  %vm58_vm2 = vweird.f32 %v52_v8 }
  0x91   :  { %v65_v16 = vor.u32 1.1754944e-38, %v64_v12  ;;  %vm63_vm5 = vcmp.eq.f32.partialorder %v62_v14, 8.507059e+37 }
  0x95   :  { %v81_v9 = vpop.eup %80 }
  0x96   :  { %v54_v10 = vmul.f32 %v81_v9, %v52_v8  ;;  %vm59_vm1 = vweird.f32 %v81_v9 }
  0x97   :  { %vm60_vm3 = vmor %vm58_vm2, %vm59_vm1 }
  0x98   :  { %v55_v11 = vsub.f32 1.0, %v54_v10 }
  0x9a   :  { %v56_v13 = vmul.f32 %v81_v9, %v55_v11 }
  0x9c   :  { %v57_v15 = vadd.f32 %v81_v9, %v56_v13 }
  0x9e   :  { %v61_v17 = vsel %vm60_vm3, %v81_v9, %v57_v15 }
  0x9f   :  { %v66_v18 = vsel %vm63_vm5, %v65_v16, %v61_v17 }
  0xa0   :  { %68 = vst.msk [vmem:[%s162_s2] sm:$0xff] %vm67_vm4, %v66_v18 }
  0xa1   :  { %73 = vsyncpa [#allocation3], 1 }
  0xa2   :  { %74 = vsyncpa [#allocation5], 1 }

</bundles_post_ra>
